<compile_context>
chip_gen: v7x
topology: tpu7x:2x2x1
jax: 0.10.0
libtpu: 0.0.40
codegen_flags: <defaults>
</compile_context>

<pallas_src>
import jax
import jax.numpy as jnp
from jax.experimental import pallas as pl
from jax.experimental.pallas import tpu as pltpu

LANE_WIDTH = 1024                      # last dim: large multiple of 128 lanes
SUBLANES = 8                           # sublane granularity
_ROW_GROUP = SUBLANES * LANE_WIDTH     # 8192 elems = one minimal (8, 1024) slab
_DEFAULT_TILE_ROWS = 512               # 512 x 1024 x f32 = 2 MiB per block


def lr_kernel(w_ref, b_ref, x_ref, o_ref):
    # w_ref, b_ref: (1, 1) scalars in SMEM
    # x_ref, o_ref: (tile_rows, 1024) lane-dense tiles in VMEM
    o_ref[...] = x_ref[...] * w_ref[0, 0] + b_ref[0, 0]


def lr_forward(x, weight, bias, *, tile_rows=_DEFAULT_TILE_ROWS):
    """Pallas equivalent of nn.Linear(1, 1): out = x @ W.T + b.

    x:      (..., 1) float tensor (any leading batch shape; PyTorch uses (N, 1))
    weight: (1, 1)   float32 (PyTorch Linear weight, [out_f, in_f])
    bias:   (1,)     float32
    """
    orig_shape = x.shape
    n = x.size

    w = weight.reshape(()).astype(jnp.float32)
    b = bias.reshape(()).astype(jnp.float32)
    x_flat = x.reshape(-1)
    if x_flat.dtype != jnp.float32:
        x_flat = x_flat.astype(jnp.float32)

    # Small-input fast path: below one (8, 1024) slab the pallas_call fixed
    # overhead dominates, so plain XLA is strictly faster.
    if n < _ROW_GROUP:
        return (x_flat * w + b).reshape(orig_shape)

    # Pad only to a multiple of one 8x1024 row-group (not tile_rows*1024);
    # any partial last grid block is masked by Pallas, so no extra HBM pass.
    padded_n = pl.cdiv(n, _ROW_GROUP) * _ROW_GROUP
    if padded_n != n:
        x_flat = jnp.pad(x_flat, (0, padded_n - n))
    rows = padded_n // LANE_WIDTH                      # multiple of 8

    # Row tile: multiple of 8, capped by the slab height.
    tr = min(int(tile_rows), rows)
    tr = max(SUBLANES, (tr // SUBLANES) * SUBLANES)
    grid = (pl.cdiv(rows, tr),)

    x2d = x_flat.reshape(rows, LANE_WIDTH)
    w_smem = w.reshape(1, 1)
    b_smem = b.reshape(1, 1)

    out2d = pl.pallas_call(
        lr_kernel,
        out_shape=jax.ShapeDtypeStruct((rows, LANE_WIDTH), jnp.float32),
        grid=grid,
        in_specs=[
            pl.BlockSpec(memory_space=pltpu.SMEM),              # weight scalar
            pl.BlockSpec(memory_space=pltpu.SMEM),              # bias scalar
            pl.BlockSpec((tr, LANE_WIDTH), lambda i: (i, 0)),   # x row tile
        ],
        out_specs=pl.BlockSpec((tr, LANE_WIDTH), lambda i: (i, 0)),
        compiler_params=pltpu.CompilerParams(
            dimension_semantics=("parallel",),
            vmem_limit_bytes=32 * 1024 * 1024,
        ),
    )(w_smem, b_smem, x2d)

    out_flat = out2d.reshape(-1)
    if padded_n != n:
        out_flat = out_flat[:n]      # only sliced when padding actually happened
    return out_flat.reshape(orig_shape)


if __name__ == "__main__":
    key = jax.random.PRNGKey(0)
    kx1, kx2, kx3, kw, kb = jax.random.split(key, 5)

    # Deterministic parameter init mimicking nn.Linear(1, 1):
    # uniform(-k, k) with k = 1/sqrt(in_features) = 1.0
    weight = jax.random.uniform(kw, (1, 1), dtype=jnp.float32, minval=-1.0, maxval=1.0)
    bias = jax.random.uniform(kb, (1,), dtype=jnp.float32, minval=-1.0, maxval=1.0)

    def ref_fn(x):
        return x @ weight.T + bias

    # 1) Tiny input (N=8), consistent with the module usage x = 1.2*rand([N,1]).
    #    Exercises the small-input (non-Pallas) fast path.
    x_small = 1.2 * jax.random.uniform(kx1, (8, 1), dtype=jnp.float32)
    out_small = jax.block_until_ready(lr_forward(x_small, weight, bias))
    assert out_small.shape == x_small.shape
    assert jnp.allclose(out_small, ref_fn(x_small), atol=1e-6)

    # 2) Exact-slab input (N = 16384 = 2 * 8192): Pallas path, no pad / no slice.
    x_exact = 1.2 * jax.random.uniform(kx2, (16384, 1), dtype=jnp.float32)
    out_exact = jax.block_until_ready(lr_forward(x_exact, weight, bias))
    assert out_exact.shape == x_exact.shape
    assert jnp.allclose(out_exact, ref_fn(x_exact), atol=1e-6)

    # 3) Ragged input (N = 20000) with a small row tile: exercises padding to a
    #    row-group, a multi-step parallel grid, and a masked partial last block.
    x_ragged = 1.2 * jax.random.uniform(kx3, (20000, 1), dtype=jnp.float32)
    out_ragged = jax.block_until_ready(lr_forward(x_ragged, weight, bias, tile_rows=16))
    assert out_ragged.shape == x_ragged.shape
    assert jnp.allclose(out_ragged, ref_fn(x_ragged), atol=1e-6)

    print("KERNEL_OK")
</pallas_src>

<mosaic_0001>
module attributes {stable_mosaic.version = 11 : i64} {
  func.func @lr_kernel(%arg0: i32, %arg1: memref<1x1xf32, #tpu.memory_space<smem>>, %arg2: memref<1x1xf32, #tpu.memory_space<smem>>, %arg3: memref<16x1024xf32, #tpu.memory_space<vmem>>, %arg4: memref<16x1024xf32, #tpu.memory_space<vmem>>) attributes {dimension_semantics = [#tpu.dimension_semantics<parallel>], iteration_bounds = array<i64: 1>, scalar_prefetch = 0 : i64, scratch_operands = 0 : i64, tpu.core_type = #tpu.core_type<tc>, window_params = [{transform_indices = @transform_0, window_bounds = array<i64: 1, 1>}, {transform_indices = @transform_1, window_bounds = array<i64: 1, 1>}, {transform_indices = @transform_2, window_bounds = array<i64: 16, 1024>}, {transform_indices = @transform_3, window_bounds = array<i64: 16, 1024>}]} {
    %c0 = arith.constant 0 : index
    %c0_0 = arith.constant 0 : index
    %0 = vector.load %arg3[%c0, %c0_0] : memref<16x1024xf32, #tpu.memory_space<vmem>>, vector<16x1024xf32>
    %c0_1 = arith.constant 0 : index
    %c0_2 = arith.constant 0 : index
    %1 = memref.load %arg1[%c0_1, %c0_2] : memref<1x1xf32, #tpu.memory_space<smem>>
    %2 = vector.broadcast %1 : f32 to vector<16x1024xf32>
    %3 = arith.mulf %0, %2 : vector<16x1024xf32>
    %c0_3 = arith.constant 0 : index
    %c0_4 = arith.constant 0 : index
    %4 = memref.load %arg2[%c0_3, %c0_4] : memref<1x1xf32, #tpu.memory_space<smem>>
    %5 = vector.broadcast %4 : f32 to vector<16x1024xf32>
    %6 = arith.addf %3, %5 : vector<16x1024xf32>
    %c0_5 = arith.constant 0 : index
    %c0_6 = arith.constant 0 : index
    %7 = vector.load %arg4[%c0_5, %c0_6] : memref<16x1024xf32, #tpu.memory_space<vmem>>, vector<16x1024xf32>
    tpu.vector_store %arg4[%c0_5, %c0_6], %6 {strides = array<i32>} : memref<16x1024xf32, #tpu.memory_space<vmem>>, vector<16x1024xf32>,
    return
  }
  func.func @transform_0(%arg0: i32) -> (i32, i32) {
    %c0_i32 = arith.constant 0 : i32
    %c0_i32_0 = arith.constant 0 : i32
    %c0_i32_1 = arith.constant 0 : i32
    return %c0_i32, %c0_i32_0 : i32, i32
  }
  func.func @transform_1(%arg0: i32) -> (i32, i32) {
    %c0_i32 = arith.constant 0 : i32
    %c0_i32_0 = arith.constant 0 : i32
    %c0_i32_1 = arith.constant 0 : i32
    return %c0_i32, %c0_i32_0 : i32, i32
  }
  func.func @transform_2(%arg0: i32) -> (i32, i32) {
    %c0_i32 = arith.constant 0 : i32
    %c0_i32_0 = arith.constant 0 : i32
    return %arg0, %c0_i32 : i32, i32
  }
  func.func @transform_3(%arg0: i32) -> (i32, i32) {
    %c0_i32 = arith.constant 0 : i32
    %c0_i32_0 = arith.constant 0 : i32
    return %arg0, %c0_i32 : i32, i32
  }
}

</mosaic_0001>

<bundles_post_ra>
// kernel: tpu_custom_call.1
= control target key start
LH: loop header
LB: loop body
LE: loop exit
PB: predicated region body
PF: predicated region fallthrough
CT: control target
= control target key end

     0   :  { %10 = vsyncpa [#allocation5], 0  ;;  %s246_s0 = inlined_call_operand.<no memory space> [shape: f32[1,1], index: 0, kind: input, shape index: {}]   ;;  %s247_s1 = inlined_call_operand.<no memory space> [shape: f32[1,1], index: 1, kind: input, shape index: {}]   ;;  %s248_s2 = inlined_call_operand.hbm [shape: f32[16,1024], index: 2, kind: input, shape index: {}]   ;;  %s249_s3 = inlined_call_operand.hbm [shape: f32[16,1024], index: 3, kind: output, shape index: {}]  }
   0x1   :  { %11 = vsyncpa [#allocation6], 0  ;;  %s168_s12 = smov [#allocation4]   ;;  %s120_s16 = scalar_lea.hbm %s248_s2, 2048 }
   0x2   :  { %s21_s13 = sshll.u32 %s168_s12, 4  ;;  %p121_p0 = scmp.ne.s32.totalorder %s248_s2, %s120_s16  ;;  %s22_s13 = int_to_ptr.vmem [resolvable:$true] %s21_s13 }
   0x3   :  { %p124_p1 = scmp.lt.u32.totalorder %s120_s16, %s248_s2 }
   0x5   :  { %p126_p2 = pnand %p124_p1, %p121_p0 }
   0x7   :  { %129 = shalt.err (!%p126_p2)
}
   0x8   :  { %s130_s21 = scalar_lea.vmem %s22_s13, 2048  ;;  %p135_p4 = scmp.lt.s32.totalorder %s22_s13, %s22_s13 }
   0x9   :  { %p131_p3 = scmp.ne.s32.totalorder %s22_s13, %s130_s21  ;;  %p136_p5 = scmp.lt.s32.totalorder %s130_s21, %s130_s21 }
   0xb   :  { %p137_p6 = por %p136_p5, %p135_p4 }
   0xd   :  { %p138_p7 = pnand %p137_p6, %p131_p3 }
   0xf   :  { %141 = shalt.err (!%p138_p7)
}
  0x10   :  { %s169_s22 = smov 1024   ;;  %s170_s23 = smov 64  }
  0x11   :  { %27 = dma.hbm_to_vmem [thread:$0]  %s248_s2, 2048, %s22_s13, [#allocation5], %s169_s22, %s169_s22, %s170_s23  }
  0x12   :  { %164 = dma.done.wait [#allocation5], 2048  }
  0x13   :  { %165 = vsyncadd [#allocation5], 4294965248  ;;  %v48_v0 = vstv %s246_s0  ;;  %v31_v1 = vld [vmem:[#allocation4] sm:$0xff]  ;;  %v213_v2 = vstv %s247_s1  ;;  %v32_v3 = vld [vmem:[#allocation4 + $0x8] sm:$0xff]  ;;  %s171_s0 = smov [#allocation7]  }
  0x14   :  { %v33_v4 = vld [vmem:[#allocation4 + $0x10] sm:$0xff]  ;;  %v49_v5 = vmul.f32 %v48_v0, %v31_v1  ;;  %v50_v6 = vmul.f32 %v48_v0, %v32_v3  ;;  %v34_v8 = vld [vmem:[#allocation4 + $0x18] sm:$0xff]  ;;  %v35_v9 = vld [vmem:[#allocation4 + $0x20] sm:$0xff]  ;;  %s104_s1 = sshll.u32 %s171_s0, 4  ;;  %s105_s1 = int_to_ptr.vmem [resolvable:$true] %s104_s1 }
  0x15   :  { %v51_v7 = vmul.f32 %v48_v0, %v33_v4  ;;  %v36_v10 = vld [vmem:[#allocation4 + $0x28] sm:$0xff]  ;;  %v52_v11 = vmul.f32 %v48_v0, %v34_v8  ;;  %v53_v12 = vmul.f32 %v48_v0, %v35_v9  ;;  %v37_v14 = vld [vmem:[#allocation4 + $0x30] sm:$0xff]  ;;  %v38_v15 = vld [vmem:[#allocation4 + $0x38] sm:$0xff]  ;;  %s142_s2 = scalar_lea.vmem %s105_s1, 2048  ;;  %p147_p9 = scmp.lt.s32.totalorder %s105_s1, %s105_s1 }
  0x16   :  { %v54_v13 = vmul.f32 %v48_v0, %v36_v10  ;;  %v39_v16 = vld [vmem:[#allocation4 + $0x40] sm:$0xff]  ;;  %v67_v17 = vadd.f32 %v213_v2, %v49_v5  ;;  %v68_v18 = vadd.f32 %v213_v2, %v50_v6  ;;  %v55_v20 = vmul.f32 %v48_v0, %v37_v14  ;;  %v40_v21 = vld [vmem:[#allocation4 + $0x48] sm:$0xff]  ;;  %v41_v22 = vld [vmem:[#allocation4 + $0x50] sm:$0xff]  ;;  %p143_p8 = scmp.ne.s32.totalorder %s105_s1, %s142_s2  ;;  %p148_p10 = scmp.lt.s32.totalorder %s142_s2, %s142_s2 }
  0x17   :  { %v69_v19 = vadd.f32 %v213_v2, %v51_v7  ;;  %v42_v23 = vld [vmem:[#allocation4 + $0x58] sm:$0xff]  ;;  %v70_v24 = vadd.f32 %v213_v2, %v52_v11  ;;  %v71_v25 = vadd.f32 %v213_v2, %v53_v12  ;;  %v56_v27 = vmul.f32 %v48_v0, %v38_v15  ;;  %v43_v28 = vld [vmem:[#allocation4 + $0x60] sm:$0xff]  ;;  %v44_v29 = vld [vmem:[#allocation4 + $0x68] sm:$0xff] }
  0x18   :  { %v72_v26 = vadd.f32 %v213_v2, %v54_v13  ;;  %v45_v30 = vld [vmem:[#allocation4 + $0x70] sm:$0xff]  ;;  %83 = vst [vmem:[#allocation7] sm:$0xff] %v67_v17  ;;  %84 = vst [vmem:[#allocation7 + $0x8] sm:$0xff] %v68_v18  ;;  %v73_v31 = vadd.f32 %v213_v2, %v55_v20  ;;  %v57_v32 = vmul.f32 %v48_v0, %v39_v16  ;;  %v46_v35 = vld [vmem:[#allocation4 + $0x78] sm:$0xff]  ;;  %p149_p11 = por %p148_p10, %p147_p9 }
  0x19   :  { %85 = vst [vmem:[#allocation7 + $0x10] sm:$0xff] %v69_v19  ;;  %v58_v33 = vmul.f32 %v48_v0, %v40_v21  ;;  %v59_v34 = vmul.f32 %v48_v0, %v41_v22  ;;  %86 = vst [vmem:[#allocation7 + $0x18] sm:$0xff] %v70_v24  ;;  %v74_v36 = vadd.f32 %v213_v2, %v56_v27 }
  0x1a   :  { %87 = vst [vmem:[#allocation7 + $0x20] sm:$0xff] %v71_v25  ;;  %88 = vst [vmem:[#allocation7 + $0x28] sm:$0xff] %v72_v26  ;;  %v60_v37 = vmul.f32 %v48_v0, %v42_v23  ;;  %v61_v38 = vmul.f32 %v48_v0, %v43_v28  ;;  %v62_v39 = vmul.f32 %v48_v0, %v44_v29  ;;  %p150_p12 = pnand %p149_p11, %p143_p8 }
  0x1b   :  { %89 = vst [vmem:[#allocation7 + $0x30] sm:$0xff] %v73_v31  ;;  %v75_v40 = vadd.f32 %v213_v2, %v57_v32  ;;  %v76_v41 = vadd.f32 %v213_v2, %v58_v33  ;;  %v77_v42 = vadd.f32 %v213_v2, %v59_v34  ;;  %v63_v43 = vmul.f32 %v48_v0, %v45_v30 }
  0x1c   :  { %90 = vst [vmem:[#allocation7 + $0x38] sm:$0xff] %v74_v36  ;;  %v78_v44 = vadd.f32 %v213_v2, %v60_v37  ;;  %v79_v45 = vadd.f32 %v213_v2, %v61_v38  ;;  %v80_v46 = vadd.f32 %v213_v2, %v62_v39  ;;  %v64_v47 = vmul.f32 %v48_v0, %v46_v35 }
  0x1d   :  { %91 = vst [vmem:[#allocation7 + $0x40] sm:$0xff] %v75_v40  ;;  %92 = vst [vmem:[#allocation7 + $0x48] sm:$0xff] %v76_v41  ;;  %v81_v48 = vadd.f32 %v213_v2, %v63_v43 }
  0x1e   :  { %93 = vst [vmem:[#allocation7 + $0x50] sm:$0xff] %v77_v42  ;;  %94 = vst [vmem:[#allocation7 + $0x58] sm:$0xff] %v78_v44  ;;  %v82_v49 = vadd.f32 %v213_v2, %v64_v47 }
  0x1f   :  { %95 = vst [vmem:[#allocation7 + $0x60] sm:$0xff] %v79_v45  ;;  %96 = vst [vmem:[#allocation7 + $0x68] sm:$0xff] %v80_v46 }
  0x20   :  { %97 = vst [vmem:[#allocation7 + $0x70] sm:$0xff] %v81_v48  ;;  %98 = vst [vmem:[#allocation7 + $0x78] sm:$0xff] %v82_v49 }
  0x21   :  { %153 = shalt.err (!%p150_p12)
}
  0x22   :  { %s154_s5 = scalar_lea.hbm %s249_s3, 2048 }
  0x23   :  { %p155_p13 = scmp.ne.s32.totalorder %s249_s3, %s154_s5  ;;  %p158_p0 = scmp.lt.u32.totalorder %s154_s5, %s249_s3 }
  0x25   :  { %p160_p1 = pnand %p158_p0, %p155_p13 }
  0x27   :  { %163 = shalt.err (!%p160_p1)
}
  0x28   :  { %110 = dma.vmem_to_hbm [thread:$0]  %s105_s1, 2048, %s249_s3, [#allocation6], %s169_s22, %s169_s22, %s170_s23  }
  0x29   :  { %166 = dma.done.wait [#allocation6], 2048  }
  0x2a   :  { %167 = vsyncadd [#allocation6], 4294965248 }
  0x2b   :  { %114 = vsyncpa [#allocation5], 1 }
  0x2c   :  { %115 = vsyncpa [#allocation6], 1 }

</bundles_post_ra>
